<compile_context>
chip_gen: v6e
topology: v6e:2x2x1
jax: 0.10.0
libtpu: 0.0.40
codegen_flags: <defaults>
</compile_context>

<pallas_src>
import jax
import jax.numpy as jnp
from jax.experimental import pallas as pl
from jax.experimental.pallas import tpu as pltpu


def _patch_unembed_kernel(x_ref, o_ref):
    # x_ref: (TS, C) token-major tile; o_ref: (C, TS) lane-dense output tile.
    # Single XLU transpose per tile; purely HBM-bandwidth-bound.
    o_ref[...] = x_ref[...].T


def _pick_seq_tile(HW, C, itemsize, B, *,
                   target_block_bytes=2 << 20,   # ~2 MiB input block per step
                   vmem_budget_bytes=24 << 20,   # 2x(in+out) double-buffered
                   min_steps=8):
    """Pick a lane-aligned sequence tile TS (divisor of HW, multiple of 128).

    C is never tiled (full-C rows -> one contiguous DMA per input block).
    Preference order among VMEM-fitting candidates that stay under the byte
    target: enough total grid steps for DMA overlap, even step count (v7x
    2-TC split), then the largest tile.
    """
    if HW % 128 != 0:
        # Fall back to one full-extent block per batch element.
        return HW

    divisors = [ts for ts in range(128, HW + 1, 128) if HW % ts == 0]

    def blk(ts):          # input-block bytes per grid step
        return ts * C * itemsize

    def steps(ts):        # total grid steps
        return B * (HW // ts)

    fitting = [ts for ts in divisors if 4 * blk(ts) <= vmem_budget_bytes]
    if not fitting:
        return divisors[0]          # 128: huge C, smallest legal tile

    under_target = [ts for ts in fitting if blk(ts) <= target_block_bytes]
    if not under_target:
        return fitting[0]           # even TS=128 exceeds the byte target

    def score(ts):
        return (steps(ts) >= min_steps,   # pipeline overlap
                steps(ts) % 2 == 0,       # even split across v7x's 2 TCs
                ts)                       # then: biggest block
    return max(under_target, key=score)


def patch_unembed(x, x_size, *, force_pallas=False):
    """PatchUnEmbed.forward: x (B, H*W, C), x_size (H, W) -> (B, C, H, W)."""
    B, HW, C = x.shape
    H, W = x_size
    assert HW == H * W, "token count must equal H*W"

    itemsize = x.dtype.itemsize
    total_bytes = x.size * itemsize

    # Tiny tensors: pallas_call overhead dominates; let XLA fuse the layout op.
    if not force_pallas and total_bytes < (4 << 20):
        return jnp.swapaxes(x, 1, 2).reshape(B, C, H, W)

    TS = _pick_seq_tile(HW, C, itemsize, B)

    # in + out blocks, each double-buffered.
    vmem_footprint = 4 * TS * C * itemsize
    if vmem_footprint > (48 << 20):
        # Only reachable via the non-lane-aligned full-extent fallback with a
        # huge C*HW; don't risk a compile-time VMEM OOM.
        return jnp.swapaxes(x, 1, 2).reshape(B, C, H, W)
    vmem_limit = int(min(48 << 20, max(16 << 20, vmem_footprint + (4 << 20))))

    grid = (B, HW // TS)

    # Pure data movement: no flops, read + write of the whole tensor.
    cost = pl.CostEstimate(
        flops=0,
        transcendentals=0,
        bytes_accessed=2 * total_bytes,
    )

    out_chw = pl.pallas_call(
        _patch_unembed_kernel,
        out_shape=jax.ShapeDtypeStruct((B, C, HW), x.dtype),
        grid_spec=pltpu.PrefetchScalarGridSpec(
            num_scalar_prefetch=0,
            grid=grid,
            in_specs=[
                # Batch dim squeezed; full-C (contiguous) input rows.
                pl.BlockSpec((None, TS, C), lambda b, s: (b, s, 0)),
            ],
            # Lane-dense output: last dim is the (128-aligned) token tile.
            out_specs=pl.BlockSpec((None, C, TS), lambda b, s: (b, 0, s)),
        ),
        compiler_params=pltpu.CompilerParams(
            dimension_semantics=("parallel", "parallel"),
            vmem_limit_bytes=vmem_limit),
        cost_estimate=cost,
    )(x)

    # Free contiguous reshape; the kernel already produced channel-major data.
    return out_chw.reshape(B, C, H, W)


def _reference(x, x_size):
    B, HW, C = x.shape
    H, W = x_size
    return jnp.transpose(x, (0, 2, 1)).reshape(B, C, H, W)


if __name__ == "__main__":
    key = jax.random.PRNGKey(0)

    # Small shapes consistent with the module: batch=2, embed_dim=32,
    # x_size=(16, 16) -> H*W = 256 tokens.
    B, C, H, W = 2, 32, 16, 16
    x = jax.random.normal(key, (B, H * W, C), dtype=jnp.float32)

    ref = _reference(x, (H, W))

    # Exercise the Pallas kernel (bypass would trigger at this tiny size).
    out = patch_unembed(x, (H, W), force_pallas=True)
    out = jax.block_until_ready(out)
    assert out.shape == (B, C, H, W)
    assert jnp.array_equal(out, ref), "mismatch vs reference (pallas path)"

    # Also check the small-tensor bypass path used in production for tiny inputs.
    out_small = jax.block_until_ready(patch_unembed(x, (H, W)))
    assert jnp.array_equal(out_small, ref), "mismatch vs reference (bypass path)"

    print("KERNEL_OK")
</pallas_src>

<mosaic_0001>
module attributes {stable_mosaic.version = 11 : i64} {
  func.func @_patch_unembed_kernel(%arg0: i32, %arg1: i32, %arg2: memref<1x256x32xf32, #tpu.memory_space<vmem>>, %arg3: memref<1x32x256xf32, #tpu.memory_space<vmem>>) attributes {dimension_semantics = [#tpu.dimension_semantics<parallel>, #tpu.dimension_semantics<parallel>], iteration_bounds = array<i64: 2, 1>, scalar_prefetch = 0 : i64, scratch_operands = 0 : i64, tpu.core_type = #tpu.core_type<tc>, window_params = [{transform_indices = @transform_0, window_bounds = array<i64: 1, 256, 32>}, {transform_indices = @transform_1, window_bounds = array<i64: 1, 32, 256>}]} {
    %c0 = arith.constant 0 : index
    %c0_0 = arith.constant 0 : index
    %c0_1 = arith.constant 0 : index
    %0 = vector.load %arg2[%c0, %c0_0, %c0_1] : memref<1x256x32xf32, #tpu.memory_space<vmem>>, vector<1x256x32xf32>
    %1 = vector.shape_cast %0 : vector<1x256x32xf32> to vector<256x32xf32>
    %2 = tpu.transpose %1, [1, 0] : vector<256x32xf32> -> vector<32x256xf32>
    %c0_2 = arith.constant 0 : index
    %c0_3 = arith.constant 0 : index
    %c0_4 = arith.constant 0 : index
    %3 = vector.load %arg3[%c0_2, %c0_3, %c0_4] : memref<1x32x256xf32, #tpu.memory_space<vmem>>, vector<1x32x256xf32>
    %4 = vector.shape_cast %3 : vector<1x32x256xf32> to vector<32x256xf32>
    %5 = vector.shape_cast %2 : vector<32x256xf32> to vector<1x32x256xf32>
    tpu.vector_store %arg3[%c0_2, %c0_3, %c0_4], %5 {strides = array<i32>} : memref<1x32x256xf32, #tpu.memory_space<vmem>>, vector<1x32x256xf32>,
    return
  }
  func.func @transform_0(%arg0: i32, %arg1: i32) -> (i32, i32, i32) {
    %c0_i32 = arith.constant 0 : i32
    %c0_i32_0 = arith.constant 0 : i32
    return %arg0, %arg1, %c0_i32 : i32, i32, i32
  }
  func.func @transform_1(%arg0: i32, %arg1: i32) -> (i32, i32, i32) {
    %c0_i32 = arith.constant 0 : i32
    %c0_i32_0 = arith.constant 0 : i32
    return %arg0, %c0_i32, %arg1 : i32, i32, i32
  }
}

</mosaic_0001>

<bundles_post_ra>
// kernel: tpu_custom_call.1
= control target key start
LH: loop header
LB: loop body
LE: loop exit
PB: predicated region body
PF: predicated region fallthrough
CT: control target
= control target key end

     0   :  { %6 = vsyncpa [#allocation3], 0  ;;  %s656_s0 = inlined_call_operand.vmem [shape: f32[2,256,32], index: 0, kind: input, shape index: {}]   ;;  %s657_s1 = inlined_call_operand.hbm [shape: f32[2,32,256], index: 1, kind: output, shape index: {}]  }
   0x1   :  { %8 = vsyncpa [#allocation3 + $0x1], 0  ;;  %s508_s6 = smov 0   ;;  %s510_s7 = smov 0  }
   0x2   :  { %s512_s8 = smov 0   ;;  %s514_s9 = smov 0  }
   0x3   :  { %s516_s10 = smov 0   ;;  %s518_s11 = smov 0  }
   0x4 LB: > { %s345_s12 = sadd.s32 4294967295, %s493_s11   ;;  %s346_s13 = sadd.s32 4294967294, %s493_s11   ;;  %s493_s11 = sphi %s518_s11, %s14_s11   ;;  %s489_s10 = sphi %s516_s10, %s664_s10   ;;  %s485_s9 = sphi %s514_s9, %s663_s9   ;;  %s481_s8 = sphi %s512_s8, %s662_s8   ;;  %s477_s7 = sphi %s510_s7, %s661_s7   ;;  %s473_s6 = sphi %s508_s6, %s660_s6  }
   0x5   : > { %s26_s14 = sadd.s32 1, %s489_s10  ;;  %s63_s15 = sadd.s32 1, %s481_s8 }
   0x6   : > { %p28_p0 = scmp.ge.s32.totalorder %s26_s14, 2  ;;  %p73_p1 = scmp.ne.s32.totalorder %s481_s8, %s477_s7 }
   0x7   : > { %p74_p2 = scmp.eq.s32.totalorder %s345_s12, 1  ;;  %p79_p3 = scmp.ne.s32.totalorder %s477_s7, %s473_s6 }
   0x8   : > { %s666_s14 = smov (%p28_p0, %s26_s14), 0  ;;  %p80_p5 = scmp.eq.s32.totalorder %s346_s13, 1 }
   0x9   : > { %p548_p4 = por %p74_p2, %p73_p1  ;;  %s58_s17 = ssub.s32 %s489_s10, %s666_s14 }
   0xa   : > { %p349_p6 = scmp.ge.s32.totalorder %s493_s11, 1  ;;  %p61_p7 = scmp.eq.s32.totalorder %s58_s17, 0 }
   0xb   : > { %p555_p8 = por %p80_p5, %p79_p3  ;;  %p111_p9 = scmp.lt.s32.totalorder %s493_s11, 3 }
   0xc   : > { %s561_s19 = scalar_select %p61_p7, %s481_s8, %s63_s15  }
   0xd   : > { %p112_p10 = pnand %p349_p6, %p111_p9 }
   0xe   : > { %p136_p11 = scmp.lt.s32.totalorder (!%p112_p10), %s485_s9, 1  ;;  %s132_s25 = sand.u32 (!%p112_p10), 1, %s477_s7  }
   0xf   : > { %115 = sbr.rel (%p112_p10) target bundleno = 177 (0xb1), region = 24  ;;  %s350_s26 = sshll.u32 (!%p112_p10), %s132_s25, 6 }
  0x10   : > { %s134_s27 = scalar_lea.vmem (!%p112_p10), [#allocation2], %s350_s26  ;;  %s359_s29 = sshll.u32 (!%p112_p10), %s485_s9, 10 }
  0x11   : > { %s266_s28 = sshll.u32 (!%p112_p10), %s134_s27, 4  ;;  %s609_s3 = scalar_lea.hbm (!%p112_p10), %s657_s1, %s359_s29  ;;  %s604_s28 = int_to_ptr.vmem [resolvable:$true] %s266_s28 }
  0x12   : > { %s611_s4 = scalar_lea.sflag (!%p112_p10), [#allocation3], %s132_s25  ;;  %s417_s5 = scalar_lea.vmem (!%p112_p10), %s604_s28, 1024 }
  0x13   : > { %p418_p12 = scmp.ne.s32.totalorder (!%p112_p10), %s604_s28, %s417_s5 }
  0x14   : > { %s137_s20 = scalar_select %p136_p11, %s485_s9, 1 }
  0x15   : > { %p419_p13 = pnand %p418_p12, %p548_p4  ;;  %s495_s9 = smov [#allocation2]  }
  0x16   : > { %s358_s21 = sshll.u32 %s137_s20, 8  ;;  %s421_s12 = sshll.u32 %s495_s9, 4  ;;  %s422_s12 = int_to_ptr.vmem [resolvable:$false] %s421_s12 }
  0x17   : > { %s568_s24 = scalar_lea.vmem %s656_s0, %s358_s21  ;;  %p420_p0 = pneg %p419_p13 }
  0x18   : > { %v162_v0 = vld [vmem:[%s568_s24 + $0x80] sm:$0xff]  ;;  %v163_v2 = vld [vmem:[%s568_s24 + $0x88] sm:$0xff]  ;;  %v164_v4 = vld [vmem:[%s568_s24 + $0x90] sm:$0xff]  ;;  %s423_s13 = scalar_lea.vmem %s422_s12, 2048  ;;  %p424_p1 = scmp.lt.s32.totalorder %s604_s28, %s422_s12 }
  0x19   : > { %v146_v1 = vld [vmem:[%s568_s24] sm:$0xff]  ;;  %210 = vxpose.xlu1.b32.start [1/16] (narrow) %v162_v0, 32  ;;  %v147_v3 = vld [vmem:[%s568_s24 + $0x8] sm:$0xff]  ;;  %v148_v5 = vld [vmem:[%s568_s24 + $0x10] sm:$0xff]  ;;  %p425_p2 = scmp.lt.s32.totalorder %s423_s13, %s417_s5 }
  0x1a   : > { %178 = vxpose.xlu0.b32.start [1/16] (narrow) %v146_v1, 32  ;;  %v165_v6 = vld [vmem:[%s568_s24 + $0x98] sm:$0xff]  ;;  %v166_v8 = vld [vmem:[%s568_s24 + $0xa0] sm:$0xff]  ;;  %v167_v10 = vld [vmem:[%s568_s24 + $0xa8] sm:$0xff] }
  0x1b   : > { %v149_v7 = vld [vmem:[%s568_s24 + $0x18] sm:$0xff]  ;;  %v150_v9 = vld [vmem:[%s568_s24 + $0x20] sm:$0xff]  ;;  %v151_v11 = vld [vmem:[%s568_s24 + $0x28] sm:$0xff]  ;;  %p426_p3 = por %p425_p2, %p424_p1 }
  0x1c   : > { %v168_v12 = vld [vmem:[%s568_s24 + $0xb0] sm:$0xff]  ;;  %v169_v14 = vld [vmem:[%s568_s24 + $0xb8] sm:$0xff]  ;;  %v170_v16 = vld [vmem:[%s568_s24 + $0xc0] sm:$0xff] }
  0x1d   : > { %211 = vxpose.xlu1.b32.cont [2/16] (narrow) %v163_v2, 32  ;;  %v152_v13 = vld [vmem:[%s568_s24 + $0x30] sm:$0xff]  ;;  %v153_v15 = vld [vmem:[%s568_s24 + $0x38] sm:$0xff]  ;;  %v154_v17 = vld [vmem:[%s568_s24 + $0x40] sm:$0xff]  ;;  %p427_p5 = pnand %p426_p3, %p420_p0 }
  0x1e   : > { %179 = vxpose.xlu0.b32.cont [2/16] (narrow) %v147_v3, 32  ;;  %v171_v18 = vld [vmem:[%s568_s24 + $0xc8] sm:$0xff]  ;;  %v172_v20 = vld [vmem:[%s568_s24 + $0xd0] sm:$0xff]  ;;  %v173_v22 = vld [vmem:[%s568_s24 + $0xd8] sm:$0xff] }
  0x1f   : > { %v155_v19 = vld [vmem:[%s568_s24 + $0x48] sm:$0xff]  ;;  %v156_v21 = vld [vmem:[%s568_s24 + $0x50] sm:$0xff]  ;;  %v157_v23 = vld [vmem:[%s568_s24 + $0x58] sm:$0xff] }
  0x20   : > { %v174_v24 = vld [vmem:[%s568_s24 + $0xe0] sm:$0xff]  ;;  %v175_v26 = vld [vmem:[%s568_s24 + $0xe8] sm:$0xff]  ;;  %v176_v28 = vld [vmem:[%s568_s24 + $0xf0] sm:$0xff] }
  0x21   : > { %212 = vxpose.xlu1.b32.cont [3/16] (narrow) %v164_v4, 32  ;;  %v158_v25 = vld [vmem:[%s568_s24 + $0x60] sm:$0xff]  ;;  %v159_v27 = vld [vmem:[%s568_s24 + $0x68] sm:$0xff]  ;;  %v160_v29 = vld [vmem:[%s568_s24 + $0x70] sm:$0xff] }
  0x22   : > { %180 = vxpose.xlu0.b32.cont [3/16] (narrow) %v148_v5, 32  ;;  %v177_v30 = vld [vmem:[%s568_s24 + $0xf8] sm:$0xff] }
  0x23   : > { %v161_v31 = vld [vmem:[%s568_s24 + $0x78] sm:$0xff] }
  0x25   : > { %213 = vxpose.xlu1.b32.cont [4/16] (narrow) %v165_v6, 32 }
  0x26   : > { %181 = vxpose.xlu0.b32.cont [4/16] (narrow) %v149_v7, 32 }
  0x29   : > { %214 = vxpose.xlu1.b32.cont [5/16] (narrow) %v166_v8, 32 }
  0x2a   : > { %182 = vxpose.xlu0.b32.cont [5/16] (narrow) %v150_v9, 32 }
  0x2d   : > { %215 = vxpose.xlu1.b32.cont [6/16] (narrow) %v167_v10, 32 }
  0x2e   : > { %183 = vxpose.xlu0.b32.cont [6/16] (narrow) %v151_v11, 32 }
  0x31   : > { %216 = vxpose.xlu1.b32.cont [7/16] (narrow) %v168_v12, 32 }
  0x32   : > { %184 = vxpose.xlu0.b32.cont [7/16] (narrow) %v152_v13, 32 }
  0x35   : > { %217 = vxpose.xlu1.b32.cont [8/16] (narrow) %v169_v14, 32 }
  0x36   : > { %185 = vxpose.xlu0.b32.cont [8/16] (narrow) %v153_v15, 32 }
  0x39   : > { %218 = vxpose.xlu1.b32.cont [9/16] (narrow) %v170_v16, 32 }
  0x3a   : > { %186 = vxpose.xlu0.b32.cont [9/16] (narrow) %v154_v17, 32 }
  0x3d   : > { %219 = vxpose.xlu1.b32.cont [10/16] (narrow) %v171_v18, 32 }
  0x3e   : > { %187 = vxpose.xlu0.b32.cont [10/16] (narrow) %v155_v19, 32 }
  0x41   : > { %220 = vxpose.xlu1.b32.cont [11/16] (narrow) %v172_v20, 32 }
  0x42   : > { %188 = vxpose.xlu0.b32.cont [11/16] (narrow) %v156_v21, 32 }
  0x45   : > { %221 = vxpose.xlu1.b32.cont [12/16] (narrow) %v173_v22, 32 }
  0x46   : > { %189 = vxpose.xlu0.b32.cont [12/16] (narrow) %v157_v23, 32 }
  0x49   : > { %222 = vxpose.xlu1.b32.cont [13/16] (narrow) %v174_v24, 32 }
  0x4a   : > { %190 = vxpose.xlu0.b32.cont [13/16] (narrow) %v158_v25, 32 }
  0x4d   : > { %223 = vxpose.xlu1.b32.cont [14/16] (narrow) %v175_v26, 32 }
  0x4e   : > { %191 = vxpose.xlu0.b32.cont [14/16] (narrow) %v159_v27, 32 }
  0x51   : > { %224 = vxpose.xlu1.b32.cont [15/16] (narrow) %v176_v28, 32 }
  0x52   : > { %192 = vxpose.xlu0.b32.cont [15/16] (narrow) %v160_v29, 32 }
  0x55   : > { %225 = vxpose.xlu1.b32.end [16/16] (narrow) %v177_v30, 32 }
  0x56   : > { %193 = vxpose.xlu0.b32.end [16/16] (narrow) %v161_v31, 32 }
  0x95   : > { %v226_v32 = vpop.trf.xlu1 }
  0x96   : > { %v194_v33 = vpop.trf.xlu0  ;;  %243 = vst [vmem:[%s134_s27 + $0x8] sm:$0xff] %v226_v32 }
  0x97   : > { %242 = vst [vmem:[%s134_s27] sm:$0xff] %v194_v33 }
  0x99   : > { %v227_v34 = vpop.trf.xlu1 }
  0x9a   : > { %v195_v35 = vpop.trf.xlu0  ;;  %245 = vst [vmem:[%s134_s27 + $0x18] sm:$0xff] %v227_v34 }
  0x9b   : > { %244 = vst [vmem:[%s134_s27 + $0x10] sm:$0xff] %v195_v35 }
  0x9d   : > { %v228_v36 = vpop.trf.xlu1 }
  0x9e   : > { %v196_v37 = vpop.trf.xlu0  ;;  %247 = vst [vmem:[%s134_s27 + $0x28] sm:$0xff] %v228_v36 }
  0x9f   : > { %246 = vst [vmem:[%s134_s27 + $0x20] sm:$0xff] %v196_v37 }
  0xa1   : > { %v229_v38 = vpop.trf.xlu1 }
  0xa2   : > { %v197_v39 = vpop.trf.xlu0  ;;  %249 = vst [vmem:[%s134_s27 + $0x38] sm:$0xff] %v229_v38 }
  0xa3   : > { %248 = vst [vmem:[%s134_s27 + $0x30] sm:$0xff] %v197_v39 }
  0xa4   : > { %430 = shalt.err (!%p427_p5)
}
  0xa5   : > { %s431_s15 = scalar_lea.hbm %s609_s3, 1024  ;;  %s435_s21 = scalar_lea.hbm %s657_s1, 2048 }
  0xa6   : > { %p432_p6 = scmp.ne.s32.totalorder %s609_s3, %s431_s15  ;;  %p436_p10 = scmp.lt.s32.totalorder %s609_s3, %s657_s1 }
  0xa7   : > { %p437_p11 = scmp.lt.s32.totalorder %s435_s21, %s431_s15 }
  0xa8   : > { %p433_p7 = pnand %p432_p6, %p548_p4 }
  0xa9   : > { %p438_p12 = por %p437_p11, %p436_p10 }
  0xaa   : > { %p434_p9 = pneg %p433_p7 }
  0xac   : > { %p439_p13 = pnand %p438_p12, %p434_p9 }
  0xae   : > { %442 = shalt.err (!%p439_p13)
}
  0xaf   : > { %s496_s24 = smov 256   ;;  %s497_s25 = smov 16  }
  0xb0   : > { %360 = dma.vmem_to_hbm [thread:$0]  (%p548_p4), %s604_s28, 1024, %s609_s3, %s611_s4, %s496_s24, %s496_s24, %s497_s25  }
  0xb1 PF: > { %p366_p0 = scmp.ge.s32.totalorder %s493_s11, 2  ;;  %s281_s26 = sand.u32 1, %s473_s6  }
  0xb2   : > { %s282_s27 = scalar_lea.sflag [#allocation3], %s281_s26 }
  0xb3   : > { %p363_p1 = pnand %p366_p0, %p555_p8 }
  0xb5   : > { %p364_p2 = pneg %p363_p1 }
  0xb7   : > { %468 = dma.done.wait (%p364_p2), %s282_s27, 1024  }
  0xb8   : > { %470 = vsyncadd (%p364_p2), %s282_s27, 4294966272  ;;  %s14_s11 = sadd.s32 1, %s493_s11   ;;  %s660_s6 = smov %s477_s7 }
  0xb9   : > { %p11_p3 = scmp.ge.s32.totalorder %s14_s11, 4   ;;  %s661_s7 = smov %s481_s8 }
  0xba   : > { %s662_s8 = smov %s561_s19  ;;  %s663_s9 = smov %s489_s10 }
  0xbb   : > { %s664_s10 = smov %s666_s14  ;;  %13 = sbr.rel (!%p11_p3) target bundleno = 4 (0x4), region = 59 }
  0xc0   :  { %287 = vsyncpa [#allocation3], 1 }
  0xc1   :  { %289 = vsyncpa [#allocation3 + $0x1], 1 }

</bundles_post_ra>
